<compile_context>
chip_gen: v7x
topology: tpu7x:2x2x1
jax: 0.10.0
libtpu: 0.0.40
codegen_flags: <defaults>
</compile_context>

<pallas_src>
import functools
import math

import jax
import jax.numpy as jnp
from jax.experimental import pallas as pl
from jax.experimental.pallas import tpu as pltpu


# --------------------------------------------------------------------------- #
# Kernel 1: RMSNorm + fused QKV matmul + RoPE (half-rotation layout)
# --------------------------------------------------------------------------- #

def qkv_rope_kernel(x_ref, anw_ref, wqkv_ref, cos_ref, sin_ref,
                    q_ref, k_ref, v_ref, *, dim, eps):
  x = x_ref[0]                                    # (TS, D) f32
  ms = jnp.mean(x * x, axis=-1, keepdims=True)
  xn = x * jax.lax.rsqrt(ms + eps) * anw_ref[...]           # f32 norm math

  # Fused Q/K/V projection: one bf16 MXU matmul instead of three.
  qkv = jnp.dot(xn.astype(jnp.bfloat16), wqkv_ref[...],
                preferred_element_type=jnp.float32)          # (TS, 3D) f32
  q = qkv[:, :dim]
  k = qkv[:, dim:2 * dim]
  v = qkv[:, 2 * dim:]

  cos = cos_ref[...]
  sin = sin_ref[...]
  half = dim // 2

  def rope(t):
    # Half-rotation layout (weights pre-permuted on host to [re-block|im-block]):
    # rotate_half = [-im | re]  -> one cross-lane concat + FMA.
    rot = jnp.concatenate([-t[:, half:], t[:, :half]], axis=1)
    return t * cos + rot * sin

  q_ref[0] = rope(q).astype(q_ref.dtype)
  k_ref[0] = rope(k).astype(k_ref.dtype)
  v_ref[0] = v.astype(v_ref.dtype)


# --------------------------------------------------------------------------- #
# Kernel 2: flash attention (online softmax, in-kernel causal mask)
# --------------------------------------------------------------------------- #

def flash_attn_kernel(q_ref, k_ref, v_ref, o_ref, m_sc, l_sc, acc_sc,
                      *, tq, tk, scale):
  ki = pl.program_id(3)

  @pl.when(ki == 0)
  def _init():
    m_sc[...] = jnp.full_like(m_sc, -jnp.inf)
    l_sc[...] = jnp.zeros_like(l_sc)
    acc_sc[...] = jnp.zeros_like(acc_sc)

  q_start = pl.program_id(2) * tq
  k_start = ki * tk

  # Causal block skip: only KV blocks with k_start <= last query row matter.
  @pl.when(k_start <= q_start + tq - 1)
  def _compute():
    q = q_ref[0, 0]                               # (TQ, hd) bf16
    k = k_ref[0, 0]                               # (TK, hd) bf16
    s = jnp.dot(q, k.T, preferred_element_type=jnp.float32) * scale
    # Causal mask generated in-kernel (no (S,S) mask DMA).
    rows = q_start + jax.lax.broadcasted_iota(jnp.int32, s.shape, 0)
    cols = k_start + jax.lax.broadcasted_iota(jnp.int32, s.shape, 1)
    s = jnp.where(rows >= cols, s, -1e9)

    m_prev = m_sc[...]
    m_new = jnp.maximum(m_prev, s.max(axis=-1, keepdims=True))
    alpha = jnp.exp(m_prev - m_new)
    p = jnp.exp(s - m_new)
    l_sc[...] = alpha * l_sc[...] + p.sum(axis=-1, keepdims=True)
    acc_sc[...] = alpha * acc_sc[...] + jnp.dot(
        p.astype(v_ref.dtype), v_ref[0, 0], preferred_element_type=jnp.float32)
    m_sc[...] = m_new

  @pl.when(ki == pl.num_programs(3) - 1)
  def _finalize():
    inv_l = pl.reciprocal(l_sc[...], approx=True)
    o_ref[0, 0] = (acc_sc[...] * inv_l).astype(o_ref.dtype)


# --------------------------------------------------------------------------- #
# Kernel 3: output projection + residual + RMSNorm + SwiGLU FFN (H tiled)
# --------------------------------------------------------------------------- #

def oproj_ffn_kernel(attn_ref, x_ref, wo_ref, fnw_ref, w13_ref, w2_ref,
                     out_ref, h_sc, hn_sc, acc_sc, *, th, eps):
  c = pl.program_id(2)

  @pl.when(c == 0)
  def _init():
    proj = jnp.dot(attn_ref[0], wo_ref[...],
                   preferred_element_type=jnp.float32)       # (TS, D) f32
    h = x_ref[0] + proj                                      # residual (f32)
    h_sc[...] = h
    ms = jnp.mean(h * h, axis=-1, keepdims=True)
    hn = h * jax.lax.rsqrt(ms + eps) * fnw_ref[...]
    hn_sc[...] = hn.astype(hn_sc.dtype)                      # bf16 MXU operand
    acc_sc[...] = jnp.zeros_like(acc_sc)

  # Per-chunk fused (D, 2*TH) slab gives SiLU gate and up-projection together.
  hn = hn_sc[...]
  gu = jnp.dot(hn, w13_ref[0], preferred_element_type=jnp.float32)  # (TS, 2TH)
  g = gu[:, :th]
  u = gu[:, th:]
  act = (g * jax.nn.sigmoid(g) * u).astype(jnp.bfloat16)      # SiLU in f32
  acc_sc[...] = acc_sc[...] + jnp.dot(act, w2_ref[...],
                                      preferred_element_type=jnp.float32)

  @pl.when(c == pl.num_programs(2) - 1)
  def _finalize():
    out_ref[0] = h_sc[...] + acc_sc[...]


# --------------------------------------------------------------------------- #
# Wrapper
# --------------------------------------------------------------------------- #

def _vmem_limit(block_bytes):
  # double-buffering + headroom, clamped to a v7x-safe ceiling.
  return int(min(64 * 1024 * 1024, max(16 * 1024 * 1024, 2.5 * block_bytes)))


def transformer_block(x, cos, sin, params, *, n_heads, head_dim, eps=1e-6):
  """x: (B, S, D) f32; cos/sin: (S, head_dim//2) f32; params in (in, out) layout."""
  B, S, D = x.shape
  H = params["w1_t"].shape[1]
  hd = head_dim
  half = hd // 2

  TS = min(S, 256)            # row tile for the projection / FFN kernels
  TQ = min(S, 256)            # flash query tile
  TK = min(S, 256)            # flash KV tile
  TH = min(H, 512)            # FFN hidden-dim chunk
  assert S % TS == 0 and S % TQ == 0 and S % TK == 0 and H % TH == 0
  nS, nQ, nKV, nH = S // TS, S // TQ, S // TK, H // TH

  # ---- one-time host-side layout plumbing (no compute hoisting) ----
  # Half-rotation column permutation for Q/K: [all re | all im], head-major.
  h_idx = jnp.arange(n_heads)
  p_idx = jnp.arange(half)
  re_cols = (h_idx[:, None] * hd + 2 * p_idx[None, :]).reshape(-1)
  perm = jnp.concatenate([re_cols, re_cols + 1])                      # (D,)

  wqkv = jnp.concatenate([params["wq_t"][:, perm],
                          params["wk_t"][:, perm],
                          params["wv_t"]], axis=1).astype(jnp.bfloat16)  # (D,3D)
  cos_full = jnp.tile(cos, (1, 2 * n_heads)).astype(jnp.float32)         # (S,D)
  sin_full = jnp.tile(sin, (1, 2 * n_heads)).astype(jnp.float32)
  wo = params["wo_t"].astype(jnp.bfloat16)                               # (D,D)
  # Fused per-chunk w1/w3 slabs: (nH, D, 2*TH).
  w1c = params["w1_t"].reshape(D, nH, TH).transpose(1, 0, 2)
  w3c = params["w3_t"].reshape(D, nH, TH).transpose(1, 0, 2)
  w13 = jnp.concatenate([w1c, w3c], axis=2).astype(jnp.bfloat16)
  w2 = params["w2_t"].astype(jnp.bfloat16)                               # (H,D)
  anw = params["attn_norm_w"].astype(jnp.float32)                        # (1,D)
  fnw = params["ffn_norm_w"].astype(jnp.float32)                         # (1,D)

  # ---------------- kernel 1: norm + fused QKV + RoPE ----------------
  bs1 = TS * D * 4 + D * 4 + D * 3 * D * 2 + 2 * TS * D * 4 + 3 * TS * D * 2
  q, k, v = pl.pallas_call(
      functools.partial(qkv_rope_kernel, dim=D, eps=eps),
      out_shape=(jax.ShapeDtypeStruct((B, S, D), jnp.bfloat16),) * 3,
      grid_spec=pltpu.PrefetchScalarGridSpec(
          num_scalar_prefetch=0,
          grid=(B, nS),
          in_specs=[
              pl.BlockSpec((1, TS, D), lambda b, s: (b, s, 0)),   # x
              pl.BlockSpec((1, D), lambda b, s: (0, 0)),          # attn norm w
              pl.BlockSpec((D, 3 * D), lambda b, s: (0, 0)),      # fused wqkv
              pl.BlockSpec((TS, D), lambda b, s: (s, 0)),         # cos
              pl.BlockSpec((TS, D), lambda b, s: (s, 0)),         # sin
          ],
          out_specs=[pl.BlockSpec((1, TS, D), lambda b, s: (b, s, 0))] * 3,
      ),
      compiler_params=pltpu.CompilerParams(
          dimension_semantics=("parallel", "parallel"),
          vmem_limit_bytes=_vmem_limit(bs1)),
  )(x, anw, wqkv, cos_full, sin_full)

  # Layout plumbing between kernels (plain XLA): heads to the front.
  qh = q.reshape(B, S, 2, n_heads, half).transpose(0, 3, 1, 2, 4)
  qh = qh.reshape(B, n_heads, S, hd)
  kh = k.reshape(B, S, 2, n_heads, half).transpose(0, 3, 1, 2, 4)
  kh = kh.reshape(B, n_heads, S, hd)
  vh = v.reshape(B, S, n_heads, hd).transpose(0, 2, 1, 3)

  # ---------------- kernel 2: flash attention ----------------
  bs2 = 2 * TQ * hd * 2 + 2 * TK * hd * 2 + TQ * (hd + 2) * 4
  o = pl.pallas_call(
      functools.partial(flash_attn_kernel, tq=TQ, tk=TK,
                        scale=1.0 / math.sqrt(hd)),
      out_shape=jax.ShapeDtypeStruct((B, n_heads, S, hd), jnp.bfloat16),
      grid_spec=pltpu.PrefetchScalarGridSpec(
          num_scalar_prefetch=0,
          grid=(B, n_heads, nQ, nKV),
          in_specs=[
              pl.BlockSpec((1, 1, TQ, hd), lambda b, h, qi, ki: (b, h, qi, 0)),
              pl.BlockSpec((1, 1, TK, hd), lambda b, h, qi, ki: (b, h, ki, 0)),
              pl.BlockSpec((1, 1, TK, hd), lambda b, h, qi, ki: (b, h, ki, 0)),
          ],
          out_specs=pl.BlockSpec((1, 1, TQ, hd),
                                 lambda b, h, qi, ki: (b, h, qi, 0)),
          scratch_shapes=[pltpu.VMEM((TQ, 1), jnp.float32),   # running max
                          pltpu.VMEM((TQ, 1), jnp.float32),   # running sum
                          pltpu.VMEM((TQ, hd), jnp.float32)], # accumulator
      ),
      compiler_params=pltpu.CompilerParams(
          dimension_semantics=("parallel", "parallel", "parallel", "arbitrary"),
          vmem_limit_bytes=_vmem_limit(bs2)),
  )(qh, kh, vh)

  attn = o.transpose(0, 2, 1, 3).reshape(B, S, D)   # back to (B, S, D), bf16

  # ---------------- kernel 3: wo + residual + FFN (H tiled) ----------------
  bs3 = (TS * D * 2 + TS * D * 4 + D * D * 2 + D * 4 + D * 2 * TH * 2
         + TH * D * 2 + TS * D * 4 + 2 * TS * D * 4 + TS * D * 2)
  out = pl.pallas_call(
      functools.partial(oproj_ffn_kernel, th=TH, eps=eps),
      out_shape=jax.ShapeDtypeStruct((B, S, D), jnp.float32),
      grid_spec=pltpu.PrefetchScalarGridSpec(
          num_scalar_prefetch=0,
          grid=(B, nS, nH),
          in_specs=[
              pl.BlockSpec((1, TS, D), lambda b, s, c: (b, s, 0)),      # attn
              pl.BlockSpec((1, TS, D), lambda b, s, c: (b, s, 0)),      # x
              pl.BlockSpec((D, D), lambda b, s, c: (0, 0)),             # wo
              pl.BlockSpec((1, D), lambda b, s, c: (0, 0)),             # ffn norm
              pl.BlockSpec((1, D, 2 * TH), lambda b, s, c: (c, 0, 0)),  # w13 chunk
              pl.BlockSpec((TH, D), lambda b, s, c: (c, 0)),            # w2 chunk
          ],
          out_specs=pl.BlockSpec((1, TS, D), lambda b, s, c: (b, s, 0)),
          scratch_shapes=[pltpu.VMEM((TS, D), jnp.float32),    # h (residual)
                          pltpu.VMEM((TS, D), jnp.bfloat16),   # normalized h
                          pltpu.VMEM((TS, D), jnp.float32)],   # ffn accumulator
      ),
      compiler_params=pltpu.CompilerParams(
          dimension_semantics=("parallel", "parallel", "arbitrary"),
          vmem_limit_bytes=_vmem_limit(bs3)),
  )(attn, x, wo, fnw, w13, w2)

  return out


# --------------------------------------------------------------------------- #
# Pure-JAX reference (mirrors the PyTorch TransformerBlock.forward, f32)
# --------------------------------------------------------------------------- #

def reference_block(x, cos, sin, params, *, n_heads, head_dim, eps=1e-6):
  B, S, D = x.shape

  def rms(v, w):
    return v * jax.lax.rsqrt(jnp.mean(v * v, -1, keepdims=True) + eps) * w

  xn = rms(x, params["attn_norm_w"][0])
  xq = (xn @ params["wq_t"]).reshape(B, S, n_heads, head_dim)
  xk = (xn @ params["wk_t"]).reshape(B, S, n_heads, head_dim)
  xv = (xn @ params["wv_t"]).reshape(B, S, n_heads, head_dim)

  def rope(t):
    t2 = t.reshape(B, S, n_heads, head_dim // 2, 2)
    re, im = t2[..., 0], t2[..., 1]
    c = cos[None, :, None, :]
    s = sin[None, :, None, :]
    out = jnp.stack([re * c - im * s, re * s + im * c], axis=-1)
    return out.reshape(B, S, n_heads, head_dim)

  xq, xk = rope(xq), rope(xk)
  xq = xq.transpose(0, 2, 1, 3)
  xk = xk.transpose(0, 2, 1, 3)
  xv = xv.transpose(0, 2, 1, 3)
  scores = jnp.einsum("bhqd,bhkd->bhqk", xq, xk) / math.sqrt(head_dim)
  mask = jnp.where(jnp.arange(S)[None, :] > jnp.arange(S)[:, None],
                   jnp.float32(-1e9), jnp.float32(0.0))
  scores = scores + mask[None, None]
  probs = jax.nn.softmax(scores, axis=-1)
  out = jnp.einsum("bhqk,bhkd->bhqd", probs, xv)
  out = out.transpose(0, 2, 1, 3).reshape(B, S, D)
  h = x + out @ params["wo_t"]

  hn = rms(h, params["ffn_norm_w"][0])
  ff = (jax.nn.silu(hn @ params["w1_t"]) * (hn @ params["w3_t"])) @ params["w2_t"]
  return h + ff


# --------------------------------------------------------------------------- #
# Main
# --------------------------------------------------------------------------- #

if __name__ == "__main__":
  B, S = 2, 8
  DIM, N_HEADS = 32, 4
  HEAD_DIM = DIM // N_HEADS
  HIDDEN = 4 * DIM
  EPS = 1e-6

  key = jax.random.PRNGKey(0)
  keys = jax.random.split(key, 8)

  x = jax.random.normal(keys[0], (B, S, DIM), dtype=jnp.float32)

  # Parameters (Linear weights stored transposed: in x out), f32 originals.
  params = {
      "wq_t": 0.08 * jax.random.normal(keys[1], (DIM, DIM), jnp.float32),
      "wk_t": 0.08 * jax.random.normal(keys[2], (DIM, DIM), jnp.float32),
      "wv_t": 0.08 * jax.random.normal(keys[3], (DIM, DIM), jnp.float32),
      "wo_t": 0.08 * jax.random.normal(keys[4], (DIM, DIM), jnp.float32),
      "w1_t": 0.08 * jax.random.normal(keys[5], (DIM, HIDDEN), jnp.float32),
      "w2_t": 0.08 * jax.random.normal(keys[6], (HIDDEN, DIM), jnp.float32),
      "w3_t": 0.08 * jax.random.normal(keys[7], (DIM, HIDDEN), jnp.float32),
      "attn_norm_w": jnp.ones((1, DIM), jnp.float32),
      "ffn_norm_w": jnp.ones((1, DIM), jnp.float32),
  }

  # RoPE tables (LLaMA precompute_freqs_cis, theta=10000): (S, head_dim//2).
  inv_freq = 1.0 / (10000.0 ** (jnp.arange(0, HEAD_DIM, 2, dtype=jnp.float32)
                                / HEAD_DIM))
  angles = jnp.arange(S, dtype=jnp.float32)[:, None] * inv_freq[None, :]
  cos = jnp.cos(angles)
  sin = jnp.sin(angles)

  run = jax.jit(functools.partial(transformer_block, n_heads=N_HEADS,
                                  head_dim=HEAD_DIM, eps=EPS))
  out = jax.block_until_ready(run(x, cos, sin, params))

  ref = jax.block_until_ready(
      reference_block(x, cos, sin, params,
                      n_heads=N_HEADS, head_dim=HEAD_DIM, eps=EPS))

  assert out.shape == (B, S, DIM)
  # bf16 MXU inputs (f32 accumulation) vs. pure-f32 reference -> looser tol.
  assert jnp.allclose(out, ref, rtol=2e-2, atol=2e-2), (
      float(jnp.max(jnp.abs(out - ref))))

  print("KERNEL_OK")
</pallas_src>

<mosaic_0001>
module attributes {stable_mosaic.version = 11 : i64} {
  func.func @qkv_rope_kernel(%arg0: i32, %arg1: i32, %arg2: memref<1x8x32xf32, #tpu.memory_space<vmem>>, %arg3: memref<1x32xf32, #tpu.memory_space<vmem>>, %arg4: memref<32x96xbf16, #tpu.memory_space<vmem>>, %arg5: memref<8x32xf32, #tpu.memory_space<vmem>>, %arg6: memref<8x32xf32, #tpu.memory_space<vmem>>, %arg7: memref<1x8x32xbf16, #tpu.memory_space<vmem>>, %arg8: memref<1x8x32xbf16, #tpu.memory_space<vmem>>, %arg9: memref<1x8x32xbf16, #tpu.memory_space<vmem>>) attributes {dimension_semantics = [#tpu.dimension_semantics<parallel>, #tpu.dimension_semantics<parallel>], iteration_bounds = array<i64: 2, 1>, scalar_prefetch = 0 : i64, scratch_operands = 0 : i64, tpu.core_type = #tpu.core_type<tc>, window_params = [{transform_indices = @transform_0, window_bounds = array<i64: 1, 8, 32>}, {pipeline_mode = #tpu.pipeline_mode<synchronous>, transform_indices = @transform_1, window_bounds = array<i64: 1, 32>}, {pipeline_mode = #tpu.pipeline_mode<synchronous>, transform_indices = @transform_2, window_bounds = array<i64: 32, 96>}, {transform_indices = @transform_3, window_bounds = array<i64: 8, 32>}, {transform_indices = @transform_4, window_bounds = array<i64: 8, 32>}, {transform_indices = @transform_5, window_bounds = array<i64: 1, 8, 32>}, {transform_indices = @transform_6, window_bounds = array<i64: 1, 8, 32>}, {transform_indices = @transform_7, window_bounds = array<i64: 1, 8, 32>}]} {
    %c0 = arith.constant 0 : index
    %c0_0 = arith.constant 0 : index
    %c0_1 = arith.constant 0 : index
    %0 = vector.load %arg2[%c0, %c0_0, %c0_1] : memref<1x8x32xf32, #tpu.memory_space<vmem>>, vector<1x8x32xf32>
    %1 = vector.shape_cast %0 : vector<1x8x32xf32> to vector<8x32xf32>
    %2 = arith.mulf %1, %1 : vector<8x32xf32>
    %cst = arith.constant dense<0.000000e+00> : vector<8xf32>
    %3 = vector.multi_reduction <add>, %2, %cst [1] : vector<8x32xf32> to vector<8xf32>
    %4 = vector.shape_cast %3 : vector<8xf32> to vector<8x1xf32>
    %cst_2 = arith.constant 3.200000e+01 : f32
    %5 = vector.broadcast %cst_2 : f32 to vector<8x1xf32>
    %6 = arith.divf %4, %5 : vector<8x1xf32>
    %cst_3 = arith.constant 9.99999997E-7 : f32
    %7 = vector.broadcast %cst_3 : f32 to vector<8x1xf32>
    %8 = arith.addf %6, %7 : vector<8x1xf32>
    %9 = math.rsqrt %8 : vector<8x1xf32>
    %10 = vector.broadcast %9 : vector<8x1xf32> to vector<8x32xf32>
    %11 = arith.mulf %1, %10 : vector<8x32xf32>
    %c0_4 = arith.constant 0 : index
    %c0_5 = arith.constant 0 : index
    %12 = vector.load %arg3[%c0_4, %c0_5] : memref<1x32xf32, #tpu.memory_space<vmem>>, vector<1x32xf32>
    %13 = vector.broadcast %12 : vector<1x32xf32> to vector<8x32xf32>
    %14 = arith.mulf %11, %13 : vector<8x32xf32>
    %15 = arith.truncf %14 : vector<8x32xf32> to vector<8x32xbf16>
    %c0_6 = arith.constant 0 : index
    %c0_7 = arith.constant 0 : index
    %16 = vector.load %arg4[%c0_6, %c0_7] : memref<32x96xbf16, #tpu.memory_space<vmem>>, vector<32x96xbf16>
    %cst_8 = arith.constant dense<0.000000e+00> : vector<8x96xf32>
    %17 = tpu.matmul %15, %16, %cst_8 {dimension_numbers = #tpu.dot_dimension_numbers<[1], [0], [0], [1], [0, 0, 1, 1], [], []>} : vector<8x32xbf16>, vector<32x96xbf16>, vector<8x96xf32> -> vector<8x96xf32>
    %18 = vector.extract_strided_slice %17 {offsets = [0, 0], sizes = [8, 32], strides = [1, 1]} : vector<8x96xf32> to vector<8x32xf32>
    %19 = vector.extract_strided_slice %17 {offsets = [0, 32], sizes = [8, 32], strides = [1, 1]} : vector<8x96xf32> to vector<8x32xf32>
    %20 = vector.extract_strided_slice %17 {offsets = [0, 64], sizes = [8, 32], strides = [1, 1]} : vector<8x96xf32> to vector<8x32xf32>
    %c0_9 = arith.constant 0 : index
    %c0_10 = arith.constant 0 : index
    %21 = vector.load %arg5[%c0_9, %c0_10] : memref<8x32xf32, #tpu.memory_space<vmem>>, vector<8x32xf32>
    %c0_11 = arith.constant 0 : index
    %c0_12 = arith.constant 0 : index
    %22 = vector.load %arg6[%c0_11, %c0_12] : memref<8x32xf32, #tpu.memory_space<vmem>>, vector<8x32xf32>
    %23 = vector.extract_strided_slice %18 {offsets = [0, 16], sizes = [8, 16], strides = [1, 1]} : vector<8x32xf32> to vector<8x16xf32>
    %cst_13 = arith.constant 0.000000e+00 : f32
    %24 = vector.broadcast %cst_13 : f32 to vector<8x16xf32>
    %25 = arith.subf %24, %23 : vector<8x16xf32>
    %26 = vector.extract_strided_slice %18 {offsets = [0, 0], sizes = [8, 16], strides = [1, 1]} : vector<8x32xf32> to vector<8x16xf32>
    %27 = tpu.concatenate %25, %26 in 1 : vector<8x16xf32>, vector<8x16xf32> -> vector<8x32xf32>
    %28 = arith.mulf %18, %21 : vector<8x32xf32>
    %29 = arith.mulf %27, %22 : vector<8x32xf32>
    %30 = arith.addf %28, %29 : vector<8x32xf32>
    %31 = arith.truncf %30 : vector<8x32xf32> to vector<8x32xbf16>
    %c0_14 = arith.constant 0 : index
    %c0_15 = arith.constant 0 : index
    %c0_16 = arith.constant 0 : index
    %32 = vector.load %arg7[%c0_14, %c0_15, %c0_16] : memref<1x8x32xbf16, #tpu.memory_space<vmem>>, vector<1x8x32xbf16>
    %33 = vector.shape_cast %32 : vector<1x8x32xbf16> to vector<8x32xbf16>
    %34 = vector.shape_cast %31 : vector<8x32xbf16> to vector<1x8x32xbf16>
    tpu.vector_store %arg7[%c0_14, %c0_15, %c0_16], %34 {strides = array<i32>} : memref<1x8x32xbf16, #tpu.memory_space<vmem>>, vector<1x8x32xbf16>,
    %35 = vector.extract_strided_slice %19 {offsets = [0, 16], sizes = [8, 16], strides = [1, 1]} : vector<8x32xf32> to vector<8x16xf32>
    %cst_17 = arith.constant 0.000000e+00 : f32
    %36 = vector.broadcast %cst_17 : f32 to vector<8x16xf32>
    %37 = arith.subf %36, %35 : vector<8x16xf32>
    %38 = vector.extract_strided_slice %19 {offsets = [0, 0], sizes = [8, 16], strides = [1, 1]} : vector<8x32xf32> to vector<8x16xf32>
    %39 = tpu.concatenate %37, %38 in 1 : vector<8x16xf32>, vector<8x16xf32> -> vector<8x32xf32>
    %40 = arith.mulf %19, %21 : vector<8x32xf32>
    %41 = arith.mulf %39, %22 : vector<8x32xf32>
    %42 = arith.addf %40, %41 : vector<8x32xf32>
    %43 = arith.truncf %42 : vector<8x32xf32> to vector<8x32xbf16>
    %c0_18 = arith.constant 0 : index
    %c0_19 = arith.constant 0 : index
    %c0_20 = arith.constant 0 : index
    %44 = vector.load %arg8[%c0_18, %c0_19, %c0_20] : memref<1x8x32xbf16, #tpu.memory_space<vmem>>, vector<1x8x32xbf16>
    %45 = vector.shape_cast %44 : vector<1x8x32xbf16> to vector<8x32xbf16>
    %46 = vector.shape_cast %43 : vector<8x32xbf16> to vector<1x8x32xbf16>
    tpu.vector_store %arg8[%c0_18, %c0_19, %c0_20], %46 {strides = array<i32>} : memref<1x8x32xbf16, #tpu.memory_space<vmem>>, vector<1x8x32xbf16>,
    %47 = arith.truncf %20 : vector<8x32xf32> to vector<8x32xbf16>
    %c0_21 = arith.constant 0 : index
    %c0_22 = arith.constant 0 : index
    %c0_23 = arith.constant 0 : index
    %48 = vector.load %arg9[%c0_21, %c0_22, %c0_23] : memref<1x8x32xbf16, #tpu.memory_space<vmem>>, vector<1x8x32xbf16>
    %49 = vector.shape_cast %48 : vector<1x8x32xbf16> to vector<8x32xbf16>
    %50 = vector.shape_cast %47 : vector<8x32xbf16> to vector<1x8x32xbf16>
    tpu.vector_store %arg9[%c0_21, %c0_22, %c0_23], %50 {strides = array<i32>} : memref<1x8x32xbf16, #tpu.memory_space<vmem>>, vector<1x8x32xbf16>,
    return
  }
  func.func @transform_0(%arg0: i32, %arg1: i32) -> (i32, i32, i32) {
    %c0_i32 = arith.constant 0 : i32
    %c0_i32_0 = arith.constant 0 : i32
    return %arg0, %arg1, %c0_i32 : i32, i32, i32
  }
  func.func @transform_1(%arg0: i32, %arg1: i32) -> (i32, i32) {
    %c0_i32 = arith.constant 0 : i32
    %c0_i32_0 = arith.constant 0 : i32
    %c0_i32_1 = arith.constant 0 : i32
    return %c0_i32, %c0_i32_0 : i32, i32
  }
  func.func @transform_2(%arg0: i32, %arg1: i32) -> (i32, i32) {
    %c0_i32 = arith.constant 0 : i32
    %c0_i32_0 = arith.constant 0 : i32
    %c0_i32_1 = arith.constant 0 : i32
    return %c0_i32, %c0_i32_0 : i32, i32
  }
  func.func @transform_3(%arg0: i32, %arg1: i32) -> (i32, i32) {
    %c0_i32 = arith.constant 0 : i32
    %c0_i32_0 = arith.constant 0 : i32
    return %arg1, %c0_i32 : i32, i32
  }
  func.func @transform_4(%arg0: i32, %arg1: i32) -> (i32, i32) {
    %c0_i32 = arith.constant 0 : i32
    %c0_i32_0 = arith.constant 0 : i32
    return %arg1, %c0_i32 : i32, i32
  }
  func.func @transform_5(%arg0: i32, %arg1: i32) -> (i32, i32, i32) {
    %c0_i32 = arith.constant 0 : i32
    %c0_i32_0 = arith.constant 0 : i32
    return %arg0, %arg1, %c0_i32 : i32, i32, i32
  }
  func.func @transform_6(%arg0: i32, %arg1: i32) -> (i32, i32, i32) {
    %c0_i32 = arith.constant 0 : i32
    %c0_i32_0 = arith.constant 0 : i32
    return %arg0, %arg1, %c0_i32 : i32, i32, i32
  }
  func.func @transform_7(%arg0: i32, %arg1: i32) -> (i32, i32, i32) {
    %c0_i32 = arith.constant 0 : i32
    %c0_i32_0 = arith.constant 0 : i32
    return %arg0, %arg1, %c0_i32 : i32, i32, i32
  }
}

module attributes {stable_mosaic.version = 11 : i64} {
  func.func @flash_attn_kernel(%arg0: i32, %arg1: i32, %arg2: i32, %arg3: i32, %arg4: memref<1x1x8x8xbf16, #tpu.memory_space<vmem>>, %arg5: memref<1x1x8x8xbf16, #tpu.memory_space<vmem>>, %arg6: memref<1x1x8x8xbf16, #tpu.memory_space<vmem>>, %arg7: memref<1x1x8x8xbf16, #tpu.memory_space<vmem>>, %arg8: memref<8x1xf32, #tpu.memory_space<vmem>>, %arg9: memref<8x1xf32, #tpu.memory_space<vmem>>, %arg10: memref<8x8xf32, #tpu.memory_space<vmem>>) attributes {dimension_semantics = [#tpu.dimension_semantics<parallel>, #tpu.dimension_semantics<parallel>, #tpu.dimension_semantics<parallel>, #tpu.dimension_semantics<arbitrary>], iteration_bounds = array<i64: 2, 4, 1, 1>, scalar_prefetch = 0 : i64, scratch_operands = 3 : i64, tpu.core_type = #tpu.core_type<tc>, window_params = [{transform_indices = @transform_0, window_bounds = array<i64: 1, 1, 8, 8>}, {transform_indices = @transform_1, window_bounds = array<i64: 1, 1, 8, 8>}, {transform_indices = @transform_2, window_bounds = array<i64: 1, 1, 8, 8>}, {transform_indices = @transform_3, window_bounds = array<i64: 1, 1, 8, 8>}]} {
    %c0_i32 = arith.constant 0 : i32
    %0 = arith.cmpi eq, %arg3, %c0_i32 : i32
    %1 = arith.extui %0 : i1 to i32
    %c0_i32_0 = arith.constant 0 : i32
    %2 = arith.cmpi ne, %1, %c0_i32_0 : i32
    scf.if %2 {
      %cst = arith.constant 0xFF800000 : f32
      %13 = vector.broadcast %cst : f32 to vector<8x1xf32>
      %c0 = arith.constant 0 : index
      %c0_6 = arith.constant 0 : index
      %14 = vector.load %arg8[%c0, %c0_6] : memref<8x1xf32, #tpu.memory_space<vmem>>, vector<8x1xf32>
      tpu.vector_store %arg8[%c0, %c0_6], %13 {strides = array<i32>} : memref<8x1xf32, #tpu.memory_space<vmem>>, vector<8x1xf32>,
      %cst_7 = arith.constant 0.000000e+00 : f32
      %15 = vector.broadcast %cst_7 : f32 to vector<8x1xf32>
      %c0_8 = arith.constant 0 : index
      %c0_9 = arith.constant 0 : index
      %16 = vector.load %arg9[%c0_8, %c0_9] : memref<8x1xf32, #tpu.memory_space<vmem>>, vector<8x1xf32>
      tpu.vector_store %arg9[%c0_8, %c0_9], %15 {strides = array<i32>} : memref<8x1xf32, #tpu.memory_space<vmem>>, vector<8x1xf32>,
      %cst_10 = arith.constant 0.000000e+00 : f32
      %17 = vector.broadcast %cst_10 : f32 to vector<8x8xf32>
      %c0_11 = arith.constant 0 : index
      %c0_12 = arith.constant 0 : index
      %18 = vector.load %arg10[%c0_11, %c0_12] : memref<8x8xf32, #tpu.memory_space<vmem>>, vector<8x8xf32>
      tpu.vector_store %arg10[%c0_11, %c0_12], %17 {strides = array<i32>} : memref<8x8xf32, #tpu.memory_space<vmem>>, vector<8x8xf32>,
    } else {
    }
    %c8_i32 = arith.constant 8 : i32
    %3 = arith.muli %arg2, %c8_i32 : i32
    %c8_i32_1 = arith.constant 8 : i32
    %4 = arith.muli %arg3, %c8_i32_1 : i32
    %c8_i32_2 = arith.constant 8 : i32
    %5 = arith.addi %3, %c8_i32_2 : i32
    %c1_i32 = arith.constant 1 : i32
    %6 = arith.subi %5, %c1_i32 : i32
    %7 = arith.cmpi sle, %4, %6 : i32
    %8 = arith.extui %7 : i1 to i32
    %c0_i32_3 = arith.constant 0 : i32
    %9 = arith.cmpi ne, %8, %c0_i32_3 : i32
    scf.if %9 {
      %c0 = arith.constant 0 : index
      %c0_6 = arith.constant 0 : index
      %c0_7 = arith.constant 0 : index
      %c0_8 = arith.constant 0 : index
      %13 = vector.load %arg4[%c0, %c0_6, %c0_7, %c0_8] : memref<1x1x8x8xbf16, #tpu.memory_space<vmem>>, vector<1x1x8x8xbf16>
      %14 = vector.shape_cast %13 : vector<1x1x8x8xbf16> to vector<8x8xbf16>
      %c0_9 = arith.constant 0 : index
      %c0_10 = arith.constant 0 : index
      %c0_11 = arith.constant 0 : index
      %c0_12 = arith.constant 0 : index
      %15 = vector.load %arg5[%c0_9, %c0_10, %c0_11, %c0_12] : memref<1x1x8x8xbf16, #tpu.memory_space<vmem>>, vector<1x1x8x8xbf16>
      %16 = vector.shape_cast %15 : vector<1x1x8x8xbf16> to vector<8x8xbf16>
      %17 = tpu.transpose %16, [1, 0] : vector<8x8xbf16> -> vector<8x8xbf16>
      %cst = arith.constant dense<0.000000e+00> : vector<8x8xf32>
      %18 = tpu.matmul %14, %17, %cst {dimension_numbers = #tpu.dot_dimension_numbers<[1], [0], [0], [1], [0, 0, 1, 1], [], []>} : vector<8x8xbf16>, vector<8x8xbf16>, vector<8x8xf32> -> vector<8x8xf32>
      %cst_13 = arith.constant 0.353553385 : f32
      %19 = vector.broadcast %cst_13 : f32 to vector<8x8xf32>
      %20 = arith.mulf %18, %19 : vector<8x8xf32>
      %21 = tpu.iota {dimensions = array<i32: 0>} : vector<8x8xi32>
      %22 = vector.broadcast %3 : i32 to vector<8x8xi32>
      %23 = arith.addi %22, %21 : vector<8x8xi32>
      %24 = tpu.iota {dimensions = array<i32: 1>} : vector<8x8xi32>
      %25 = vector.broadcast %4 : i32 to vector<8x8xi32>
      %26 = arith.addi %25, %24 : vector<8x8xi32>
      %27 = arith.cmpi sge, %23, %26 : vector<8x8xi32>
      %cst_14 = arith.constant -1.000000e+09 : f32
      %28 = vector.broadcast %cst_14 : f32 to vector<8x8xf32>
      %29 = arith.select %27, %20, %28 : vector<8x8xi1>, vector<8x8xf32>
      %c0_15 = arith.constant 0 : index
      %c0_16 = arith.constant 0 : index
      %30 = vector.load %arg8[%c0_15, %c0_16] : memref<8x1xf32, #tpu.memory_space<vmem>>, vector<8x1xf32>
      %cst_17 = arith.constant dense<0xFF800000> : vector<8xf32>
      %31 = vector.multi_reduction <maximumf>, %29, %cst_17 [1] : vector<8x8xf32> to vector<8xf32>
      %32 = vector.shape_cast %31 : vector<8xf32> to vector<8x1xf32>
      %33 = arith.maximumf %30, %32 : vector<8x1xf32>
      %34 = arith.subf %30, %33 : vector<8x1xf32>
      %35 = math.exp %34 : vector<8x1xf32>
      %36 = vector.broadcast %33 : vector<8x1xf32> to vector<8x8xf32>
      %37 = arith.subf %29, %36 : vector<8x8xf32>
      %38 = math.exp %37 : vector<8x8xf32>
      %c0_18 = arith.constant 0 : index
      %c0_19 = arith.constant 0 : index
      %39 = vector.load %arg9[%c0_18, %c0_19] : memref<8x1xf32, #tpu.memory_space<vmem>>, vector<8x1xf32>
      %40 = arith.mulf %35, %39 : vector<8x1xf32>
      %cst_20 = arith.constant dense<0.000000e+00> : vector<8xf32>
      %41 = vector.multi_reduction <add>, %38, %cst_20 [1] : vector<8x8xf32> to vector<8xf32>
      %42 = vector.shape_cast %41 : vector<8xf32> to vector<8x1xf32>
      %43 = arith.addf %40, %42 : vector<8x1xf32>
      %c0_21 = arith.constant 0 : index
      %c0_22 = arith.constant 0 : index
      %44 = vector.load %arg9[%c0_21, %c0_22] : memref<8x1xf32, #tpu.memory_space<vmem>>, vector<8x1xf32>
      tpu.vector_store %arg9[%c0_21, %c0_22], %43 {strides = array<i32>} : memref<8x1xf32, #tpu.memory_space<vmem>>, vector<8x1xf32>,
      %c0_23 = arith.constant 0 : index
      %c0_24 = arith.constant 0 : index
      %45 = vector.load %arg10[%c0_23, %c0_24] : memref<8x8xf32, #tpu.memory_space<vmem>>, vector<8x8xf32>
      %46 = vector.broadcast %35 : vector<8x1xf32> to vector<8x8xf32>
      %47 = arith.mulf %46, %45 : vector<8x8xf32>
      %48 = arith.truncf %38 : vector<8x8xf32> to vector<8x8xbf16>
      %c0_25 = arith.constant 0 : index
      %c0_26 = arith.constant 0 : index
      %c0_27 = arith.constant 0 : index
      %c0_28 = arith.constant 0 : index
      %49 = vector.load %arg6[%c0_25, %c0_26, %c0_27, %c0_28] : memref<1x1x8x8xbf16, #tpu.memory_space<vmem>>, vector<1x1x8x8xbf16>
      %50 = vector.shape_cast %49 : vector<1x1x8x8xbf16> to vector<8x8xbf16>
      %cst_29 = arith.constant dense<0.000000e+00> : vector<8x8xf32>
      %51 = tpu.matmul %48, %50, %cst_29 {dimension_numbers = #tpu.dot_dimension_numbers<[1], [0], [0], [1], [0, 0, 1, 1], [], []>} : vector<8x8xbf16>, vector<8x8xbf16>, vector<8x8xf32> -> vector<8x8xf32>
      %52 = arith.addf %47, %51 : vector<8x8xf32>
      %c0_30 = arith.constant 0 : index
      %c0_31 = arith.constant 0 : index
      %53 = vector.load %arg10[%c0_30, %c0_31] : memref<8x8xf32, #tpu.memory_space<vmem>>, vector<8x8xf32>
      tpu.vector_store %arg10[%c0_30, %c0_31], %52 {strides = array<i32>} : memref<8x8xf32, #tpu.memory_space<vmem>>, vector<8x8xf32>,
      %c0_32 = arith.constant 0 : index
      %c0_33 = arith.constant 0 : index
      %54 = vector.load %arg8[%c0_32, %c0_33] : memref<8x1xf32, #tpu.memory_space<vmem>>, vector<8x1xf32>
      tpu.vector_store %arg8[%c0_32, %c0_33], %33 {strides = array<i32>} : memref<8x1xf32, #tpu.memory_space<vmem>>, vector<8x1xf32>,
    } else {
    }
    %c0_i32_4 = arith.constant 0 : i32
    %10 = arith.cmpi eq, %arg3, %c0_i32_4 : i32
    %11 = arith.extui %10 : i1 to i32
    %c0_i32_5 = arith.constant 0 : i32
    %12 = arith.cmpi ne, %11, %c0_i32_5 : i32
    scf.if %12 {
      %c0 = arith.constant 0 : index
      %c0_6 = arith.constant 0 : index
      %13 = vector.load %arg9[%c0, %c0_6] : memref<8x1xf32, #tpu.memory_space<vmem>>, vector<8x1xf32>
      %14 = tpu.reciprocal %13 {approx = true} : vector<8x1xf32> -> vector<8x1xf32>
      %c0_7 = arith.constant 0 : index
      %c0_8 = arith.constant 0 : index
      %15 = vector.load %arg10[%c0_7, %c0_8] : memref<8x8xf32, #tpu.memory_space<vmem>>, vector<8x8xf32>
      %16 = vector.broadcast %14 : vector<8x1xf32> to vector<8x8xf32>
      %17 = arith.mulf %15, %16 : vector<8x8xf32>
      %18 = arith.truncf %17 : vector<8x8xf32> to vector<8x8xbf16>
      %c0_9 = arith.constant 0 : index
      %c0_10 = arith.constant 0 : index
      %c0_11 = arith.constant 0 : index
      %c0_12 = arith.constant 0 : index
      %19 = vector.load %arg7[%c0_9, %c0_10, %c0_11, %c0_12] : memref<1x1x8x8xbf16, #tpu.memory_space<vmem>>, vector<1x1x8x8xbf16>
      %20 = vector.shape_cast %19 : vector<1x1x8x8xbf16> to vector<8x8xbf16>
      %21 = vector.shape_cast %18 : vector<8x8xbf16> to vector<1x1x8x8xbf16>
      tpu.vector_store %arg7[%c0_9, %c0_10, %c0_11, %c0_12], %21 {strides = array<i32>} : memref<1x1x8x8xbf16, #tpu.memory_space<vmem>>, vector<1x1x8x8xbf16>,
    } else {
    }
    return
  }
  func.func @transform_0(%arg0: i32, %arg1: i32, %arg2: i32, %arg3: i32) -> (i32, i32, i32, i32) {
    %c0_i32 = arith.constant 0 : i32
    %c0_i32_0 = arith.constant 0 : i32
    return %arg0, %arg1, %arg2, %c0_i32 : i32, i32, i32, i32
  }
  func.func @transform_1(%arg0: i32, %arg1: i32, %arg2: i32, %arg3: i32) -> (i32, i32, i32, i32) {
    %c0_i32 = arith.constant 0 : i32
    %c0_i32_0 = arith.constant 0 : i32
    return %arg0, %arg1, %arg3, %c0_i32 : i32, i32, i32, i32
  }
  func.func @transform_2(%arg0: i32, %arg1: i32, %arg2: i32, %arg3: i32) -> (i32, i32, i32, i32) {
    %c0_i32 = arith.constant 0 : i32
    %c0_i32_0 = arith.constant 0 : i32
    return %arg0, %arg1, %arg3, %c0_i32 : i32, i32, i32, i32
  }
  func.func @transform_3(%arg0: i32, %arg1: i32, %arg2: i32, %arg3: i32) -> (i32, i32, i32, i32) {
    %c0_i32 = arith.constant 0 : i32
    %c0_i32_0 = arith.constant 0 : i32
    return %arg0, %arg1, %arg2, %c0_i32 : i32, i32, i32, i32
  }
}

module attributes {stable_mosaic.version = 11 : i64} {
  func.func @oproj_ffn_kernel(%arg0: i32, %arg1: i32, %arg2: i32, %arg3: memref<1x8x32xbf16, #tpu.memory_space<vmem>>, %arg4: memref<1x8x32xf32, #tpu.memory_space<vmem>>, %arg5: memref<32x32xbf16, #tpu.memory_space<vmem>>, %arg6: memref<1x32xf32, #tpu.memory_space<vmem>>, %arg7: memref<1x32x256xbf16, #tpu.memory_space<vmem>>, %arg8: memref<128x32xbf16, #tpu.memory_space<vmem>>, %arg9: memref<1x8x32xf32, #tpu.memory_space<vmem>>, %arg10: memref<8x32xf32, #tpu.memory_space<vmem>>, %arg11: memref<8x32xbf16, #tpu.memory_space<vmem>>, %arg12: memref<8x32xf32, #tpu.memory_space<vmem>>) attributes {dimension_semantics = [#tpu.dimension_semantics<parallel>, #tpu.dimension_semantics<parallel>, #tpu.dimension_semantics<arbitrary>], iteration_bounds = array<i64: 2, 1, 1>, scalar_prefetch = 0 : i64, scratch_operands = 3 : i64, tpu.core_type = #tpu.core_type<tc>, window_params = [{transform_indices = @transform_0, window_bounds = array<i64: 1, 8, 32>}, {transform_indices = @transform_1, window_bounds = array<i64: 1, 8, 32>}, {pipeline_mode = #tpu.pipeline_mode<synchronous>, transform_indices = @transform_2, window_bounds = array<i64: 32, 32>}, {pipeline_mode = #tpu.pipeline_mode<synchronous>, transform_indices = @transform_3, window_bounds = array<i64: 1, 32>}, {transform_indices = @transform_4, window_bounds = array<i64: 1, 32, 256>}, {transform_indices = @transform_5, window_bounds = array<i64: 128, 32>}, {transform_indices = @transform_6, window_bounds = array<i64: 1, 8, 32>}]} {
    %c0_i32 = arith.constant 0 : i32
    %0 = arith.cmpi eq, %arg2, %c0_i32 : i32
    %1 = arith.extui %0 : i1 to i32
    %c0_i32_0 = arith.constant 0 : i32
    %2 = arith.cmpi ne, %1, %c0_i32_0 : i32
    scf.if %2 {
      %c0_15 = arith.constant 0 : index
      %c0_16 = arith.constant 0 : index
      %c0_17 = arith.constant 0 : index
      %25 = vector.load %arg3[%c0_15, %c0_16, %c0_17] : memref<1x8x32xbf16, #tpu.memory_space<vmem>>, vector<1x8x32xbf16>
      %26 = vector.shape_cast %25 : vector<1x8x32xbf16> to vector<8x32xbf16>
      %c0_18 = arith.constant 0 : index
      %c0_19 = arith.constant 0 : index
      %27 = vector.load %arg5[%c0_18, %c0_19] : memref<32x32xbf16, #tpu.memory_space<vmem>>, vector<32x32xbf16>
      %cst_20 = arith.constant dense<0.000000e+00> : vector<8x32xf32>
      %28 = tpu.matmul %26, %27, %cst_20 {dimension_numbers = #tpu.dot_dimension_numbers<[1], [0], [0], [1], [0, 0, 1, 1], [], []>} : vector<8x32xbf16>, vector<32x32xbf16>, vector<8x32xf32> -> vector<8x32xf32>
      %c0_21 = arith.constant 0 : index
      %c0_22 = arith.constant 0 : index
      %c0_23 = arith.constant 0 : index
      %29 = vector.load %arg4[%c0_21, %c0_22, %c0_23] : memref<1x8x32xf32, #tpu.memory_space<vmem>>, vector<1x8x32xf32>
      %30 = vector.shape_cast %29 : vector<1x8x32xf32> to vector<8x32xf32>
      %31 = arith.addf %30, %28 : vector<8x32xf32>
      %c0_24 = arith.constant 0 : index
      %c0_25 = arith.constant 0 : index
      %32 = vector.load %arg10[%c0_24, %c0_25] : memref<8x32xf32, #tpu.memory_space<vmem>>, vector<8x32xf32>
      tpu.vector_store %arg10[%c0_24, %c0_25], %31 {strides = array<i32>} : memref<8x32xf32, #tpu.memory_space<vmem>>, vector<8x32xf32>,
      %33 = arith.mulf %31, %31 : vector<8x32xf32>
      %cst_26 = arith.constant dense<0.000000e+00> : vector<8xf32>
      %34 = vector.multi_reduction <add>, %33, %cst_26 [1] : vector<8x32xf32> to vector<8xf32>
      %35 = vector.shape_cast %34 : vector<8xf32> to vector<8x1xf32>
      %cst_27 = arith.constant 3.200000e+01 : f32
      %36 = vector.broadcast %cst_27 : f32 to vector<8x1xf32>
      %37 = arith.divf %35, %36 : vector<8x1xf32>
      %cst_28 = arith.constant 9.99999997E-7 : f32
      %38 = vector.broadcast %cst_28 : f32 to vector<8x1xf32>
      %39 = arith.addf %37, %38 : vector<8x1xf32>
      %40 = math.rsqrt %39 : vector<8x1xf32>
      %41 = vector.broadcast %40 : vector<8x1xf32> to vector<8x32xf32>
      %42 = arith.mulf %31, %41 : vector<8x32xf32>
      %c0_29 = arith.constant 0 : index
      %c0_30 = arith.constant 0 : index
      %43 = vector.load %arg6[%c0_29, %c0_30] : memref<1x32xf32, #tpu.memory_space<vmem>>, vector<1x32xf32>
      %44 = vector.broadcast %43 : vector<1x32xf32> to vector<8x32xf32>
      %45 = arith.mulf %42, %44 : vector<8x32xf32>
      %46 = arith.truncf %45 : vector<8x32xf32> to vector<8x32xbf16>
      %c0_31 = arith.constant 0 : index
      %c0_32 = arith.constant 0 : index
      %47 = vector.load %arg11[%c0_31, %c0_32] : memref<8x32xbf16, #tpu.memory_space<vmem>>, vector<8x32xbf16>
      tpu.vector_store %arg11[%c0_31, %c0_32], %46 {strides = array<i32>} : memref<8x32xbf16, #tpu.memory_space<vmem>>, vector<8x32xbf16>,
      %cst_33 = arith.constant 0.000000e+00 : f32
      %48 = vector.broadcast %cst_33 : f32 to vector<8x32xf32>
      %c0_34 = arith.constant 0 : index
      %c0_35 = arith.constant 0 : index
      %49 = vector.load %arg12[%c0_34, %c0_35] : memref<8x32xf32, #tpu.memory_space<vmem>>, vector<8x32xf32>
      tpu.vector_store %arg12[%c0_34, %c0_35], %48 {strides = array<i32>} : memref<8x32xf32, #tpu.memory_space<vmem>>, vector<8x32xf32>,
    } else {
    }
    %c0 = arith.constant 0 : index
    %c0_1 = arith.constant 0 : index
    %3 = vector.load %arg11[%c0, %c0_1] : memref<8x32xbf16, #tpu.memory_space<vmem>>, vector<8x32xbf16>
    %c0_2 = arith.constant 0 : index
    %c0_3 = arith.constant 0 : index
    %c0_4 = arith.constant 0 : index
    %4 = vector.load %arg7[%c0_2, %c0_3, %c0_4] : memref<1x32x256xbf16, #tpu.memory_space<vmem>>, vector<1x32x256xbf16>
    %5 = vector.shape_cast %4 : vector<1x32x256xbf16> to vector<32x256xbf16>
    %cst = arith.constant dense<0.000000e+00> : vector<8x256xf32>
    %6 = tpu.matmul %3, %5, %cst {dimension_numbers = #tpu.dot_dimension_numbers<[1], [0], [0], [1], [0, 0, 1, 1], [], []>} : vector<8x32xbf16>, vector<32x256xbf16>, vector<8x256xf32> -> vector<8x256xf32>
    %7 = vector.extract_strided_slice %6 {offsets = [0, 0], sizes = [8, 128], strides = [1, 1]} : vector<8x256xf32> to vector<8x128xf32>
    %8 = vector.extract_strided_slice %6 {offsets = [0, 128], sizes = [8, 128], strides = [1, 1]} : vector<8x256xf32> to vector<8x128xf32>
    %9 = arith.negf %7 : vector<8x128xf32>
    %10 = math.exp %9 : vector<8x128xf32>
    %cst_5 = arith.constant 1.000000e+00 : f32
    %11 = vector.broadcast %cst_5 : f32 to vector<8x128xf32>
    %12 = arith.addf %11, %10 : vector<8x128xf32>
    %13 = arith.divf %11, %12 : vector<8x128xf32>
    %14 = arith.mulf %7, %13 : vector<8x128xf32>
    %15 = arith.mulf %14, %8 : vector<8x128xf32>
    %16 = arith.truncf %15 : vector<8x128xf32> to vector<8x128xbf16>
    %c0_6 = arith.constant 0 : index
    %c0_7 = arith.constant 0 : index
    %17 = vector.load %arg12[%c0_6, %c0_7] : memref<8x32xf32, #tpu.memory_space<vmem>>, vector<8x32xf32>
    %c0_8 = arith.constant 0 : index
    %c0_9 = arith.constant 0 : index
    %18 = vector.load %arg8[%c0_8, %c0_9] : memref<128x32xbf16, #tpu.memory_space<vmem>>, vector<128x32xbf16>
    %cst_10 = arith.constant dense<0.000000e+00> : vector<8x32xf32>
    %19 = tpu.matmul %16, %18, %cst_10 {dimension_numbers = #tpu.dot_dimension_numbers<[1], [0], [0], [1], [0, 0, 1, 1], [], []>} : vector<8x128xbf16>, vector<128x32xbf16>, vector<8x32xf32> -> vector<8x32xf32>
    %20 = arith.addf %17, %19 : vector<8x32xf32>
    %c0_11 = arith.constant 0 : index
    %c0_12 = arith.constant 0 : index
    %21 = vector.load %arg12[%c0_11, %c0_12] : memref<8x32xf32, #tpu.memory_space<vmem>>, vector<8x32xf32>
    tpu.vector_store %arg12[%c0_11, %c0_12], %20 {strides = array<i32>} : memref<8x32xf32, #tpu.memory_space<vmem>>, vector<8x32xf32>,
    %c0_i32_13 = arith.constant 0 : i32
    %22 = arith.cmpi eq, %arg2, %c0_i32_13 : i32
    %23 = arith.extui %22 : i1 to i32
    %c0_i32_14 = arith.constant 0 : i32
    %24 = arith.cmpi ne, %23, %c0_i32_14 : i32
    scf.if %24 {
      %c0_15 = arith.constant 0 : index
      %c0_16 = arith.constant 0 : index
      %25 = vector.load %arg10[%c0_15, %c0_16] : memref<8x32xf32, #tpu.memory_space<vmem>>, vector<8x32xf32>
      %c0_17 = arith.constant 0 : index
      %c0_18 = arith.constant 0 : index
      %26 = vector.load %arg12[%c0_17, %c0_18] : memref<8x32xf32, #tpu.memory_space<vmem>>, vector<8x32xf32>
      %27 = arith.addf %25, %26 : vector<8x32xf32>
      %c0_19 = arith.constant 0 : index
      %c0_20 = arith.constant 0 : index
      %c0_21 = arith.constant 0 : index
      %28 = vector.load %arg9[%c0_19, %c0_20, %c0_21] : memref<1x8x32xf32, #tpu.memory_space<vmem>>, vector<1x8x32xf32>
      %29 = vector.shape_cast %28 : vector<1x8x32xf32> to vector<8x32xf32>
      %30 = vector.shape_cast %27 : vector<8x32xf32> to vector<1x8x32xf32>
      tpu.vector_store %arg9[%c0_19, %c0_20, %c0_21], %30 {strides = array<i32>} : memref<1x8x32xf32, #tpu.memory_space<vmem>>, vector<1x8x32xf32>,
    } else {
    }
    return
  }
  func.func @transform_0(%arg0: i32, %arg1: i32, %arg2: i32) -> (i32, i32, i32) {
    %c0_i32 = arith.constant 0 : i32
    %c0_i32_0 = arith.constant 0 : i32
    return %arg0, %arg1, %c0_i32 : i32, i32, i32
  }
  func.func @transform_1(%arg0: i32, %arg1: i32, %arg2: i32) -> (i32, i32, i32) {
    %c0_i32 = arith.constant 0 : i32
    %c0_i32_0 = arith.constant 0 : i32
    return %arg0, %arg1, %c0_i32 : i32, i32, i32
  }
  func.func @transform_2(%arg0: i32, %arg1: i32, %arg2: i32) -> (i32, i32) {
    %c0_i32 = arith.constant 0 : i32
    %c0_i32_0 = arith.constant 0 : i32
    %c0_i32_1 = arith.constant 0 : i32
    return %c0_i32, %c0_i32_0 : i32, i32
  }
  func.func @transform_3(%arg0: i32, %arg1: i32, %arg2: i32) -> (i32, i32) {
    %c0_i32 = arith.constant 0 : i32
    %c0_i32_0 = arith.constant 0 : i32
    %c0_i32_1 = arith.constant 0 : i32
    return %c0_i32, %c0_i32_0 : i32, i32
  }
  func.func @transform_4(%arg0: i32, %arg1: i32, %arg2: i32) -> (i32, i32, i32) {
    %c0_i32 = arith.constant 0 : i32
    %c0_i32_0 = arith.constant 0 : i32
    %c0_i32_1 = arith.constant 0 : i32
    return %arg2, %c0_i32, %c0_i32_0 : i32, i32, i32
  }
  func.func @transform_5(%arg0: i32, %arg1: i32, %arg2: i32) -> (i32, i32) {
    %c0_i32 = arith.constant 0 : i32
    %c0_i32_0 = arith.constant 0 : i32
    return %arg2, %c0_i32 : i32, i32
  }
  func.func @transform_6(%arg0: i32, %arg1: i32, %arg2: i32) -> (i32, i32, i32) {
    %c0_i32 = arith.constant 0 : i32
    %c0_i32_0 = arith.constant 0 : i32
    return %arg0, %arg1, %c0_i32 : i32, i32, i32
  }
}

</mosaic_0001>

<bundles_post_ra>
// kernel: transformer_block.3
= control target key start
LH: loop header
LB: loop body
LE: loop exit
PB: predicated region body
PF: predicated region fallthrough
CT: control target
= control target key end

     0   :  { %s836_s24 = smov 0   ;;  %s838_s25 = smov 0   ;;  %s898_s0 = inlined_call_operand.vmem [shape: f32[2,8,32], index: 0, kind: input, shape index: {}]   ;;  %s899_s1 = inlined_call_operand.vmem [shape: f32[1,32], index: 1, kind: input, shape index: {}]   ;;  %s900_s2 = inlined_call_operand.vmem [shape: bf16[32,96], index: 2, kind: input, shape index: {}]   ;;  %s901_s3 = inlined_call_operand.vmem [shape: f32[8,32], index: 3, kind: input, shape index: {}]   ;;  %s902_s4 = inlined_call_operand.vmem [shape: f32[8,32], index: 4, kind: input, shape index: {}]   ;;  %s903_s5 = inlined_call_operand.vmem [shape: bf16[2,8,32], index: 5, kind: output, shape index: {0}]   ;;  %s904_s6 = inlined_call_operand.vmem [shape: bf16[2,8,32], index: 6, kind: output, shape index: {1}]   ;;  %s905_s7 = inlined_call_operand.vmem [shape: bf16[2,8,32], index: 7, kind: output, shape index: {2}]  }
   0x1   :  { %s840_s26 = smov 0  }
   0x2 LB: > { %s30_s27 = sadd.s32 1, %s782_s25  ;;  %p702_p0 = scmp.ge.s32.totalorder %s786_s26, 1  ;;  %s786_s26 = sphi %s840_s26, %s18_s26   ;;  %s782_s25 = sphi %s838_s25, %s907_s25   ;;  %s778_s24 = sphi %s836_s24, %s906_s24  }
   0x3   : > { %p32_p1 = scmp.ge.s32.totalorder %s30_s27, 2  ;;  %p282_p2 = scmp.lt.s32.totalorder %s786_s26, 3 }
   0x5   : > { %s909_s27 = smov (%p32_p1, %s30_s27), 0  ;;  %p283_p3 = pnand %p702_p0, %p282_p2 }
   0x6   : > { %p340_p4 = scmp.lt.s32.totalorder (!%p283_p3), %s778_s24, 1  ;;  %vm379_vm0 = vcmask (!%p283_p3), 261120   ;;  %v760_v3 = vld [vmem:[%s900_s2] sm:$0xff] (!%p283_p3)   ;;  %v788_v4 = vmov (!%p283_p3), 0.0   ;;  %vm789_vm1 = vmmov (!%p283_p3), 0   ;;  %v761_v5 = vld [vmem:[%s900_s2 + $0x8] sm:$0xff] (!%p283_p3)  }
   0x7   : > { %286 = sbr.rel (%p283_p3) target bundleno = 755 (0x2f3), region = 40  ;;  %720 = vmatprep.subr.bf16.mxu0 (!%p283_p3), %v788_v4  ;;  %724 = vmatprep.mubr.msk.bf16.mxu0 (!%p283_p3), %vm789_vm1, %v788_v4  ;;  %v707_v10 = vld [vmem:[%s899_s1] ss:$0 sm:$0xff] (!%p283_p3)  ;;  %s790_s17 = smov (!%p283_p3), 112   ;;  %vm467_vm2 = vcmask (!%p283_p3), 130048   ;;  %vm473_vm3 = vcmask (!%p283_p3), 257024  }
   0x8   : > { %721 = vmatpush3.bf16.msra.mxu0 (!%p283_p3), %v760_v3  ;;  %v456_v14 = vld [vmem:[%s901_s3] sm:$0xff] (!%p283_p3)  ;;  %s791_s18 = smov (!%p283_p3), 80   ;;  %s792_s19 = smov (!%p283_p3), 32  }
   0x9   : > { %722 = vmatprep.subr.bf16.mxu0 (!%p283_p3), %v788_v4  ;;  %v457_v21 = vld [vmem:[%s902_s4] sm:$0xff] (!%p283_p3)  ;;  %s793_s22 = smov (!%p283_p3), 16   ;;  %s794_s23 = smov (!%p283_p3), 96  }
   0xc   : > { %723 = vmatpush3.bf16.msra.mxu0 (!%p283_p3), %v761_v5 }
   0xe   : > { %s911_s24 = smov (!%p340_p4, %s778_s24), 1 }
   0xf   : > { %s703_s28 = sshll.u32 %s911_s24, 3  ;;  %s704_s29 = sshll.u32 %s911_s24, 2 }
  0x10   : > { %s346_s8 = scalar_lea.vmem %s898_s0, %s703_s28  ;;  %s795_s28 = smov 64  }
  0x11   : > { %v377_v0 = vld [vmem:[%s346_s8] sm:$0xff]  ;;  %s361_s9 = scalar_lea.vmem %s903_s5, %s704_s29  ;;  %s368_s12 = scalar_lea.vmem %s904_s6, %s704_s29 }
  0x12   : > { %v378_v1 = vmul.f32 %v377_v0, %v377_v0  ;;  %s375_s15 = scalar_lea.vmem %s905_s7, %s704_s29 }
  0x14   : > { %v380_v2 = vsel %vm379_vm0, %v378_v1, 0.0 }
  0x15   : > { %381 = vadd.xlane.f32.xlu0 %v380_v2 }
  0xa2   : > { %v382_v6 = vpop.xlane.xlu0 %381 }
  0xa3   : > { %v384_v7 = vmul.f32 0.03125, %v382_v6 }
  0xa5   : > { %v385_v8 = vadd.f32 1e-06, %v384_v7 }
  0xa7   : > { %762 = vrsqrt.f32 %v385_v8 }
  0xb1   : > { %v763_v9 = vpop.eup %762 }
  0xb2   : > { %v387_v11 = vmul.f32 %v763_v9, %v377_v0 }
  0xb4   : > { %v395_v12 = vmul.f32 %v707_v10, %v387_v11 }
  0xb6   : > { %v396_v13 = vpack.c.bf16 %v395_v12, %v395_v12 }
  0xb8   : > { %725 = vmatmul.mubr.msk.bf16.vlgmr.msra.gmra.mrb[0].mxu0 %vm379_vm0, %v396_v13 }
 0x18b   : > { %v450_v15 = vpop.f32.mrb[0].mxu0 }
 0x18c   : > { %478 = vrot.lane.b32.xlu1 %v450_v15, %s790_s17  ;;  %v726_v16 = vpop.f32.mrb[1].mxu0  ;;  %v458_v17 = vsub.f32 0.0, %v450_v15  ;;  %v469_v18 = vmul.f32 %v456_v14, %v450_v15  ;;  %v716_v32 = vpack.c.bf16 %v450_v15, %v450_v15 }
 0x18d   : > { %v453_v19 = vpop.f32.mrb[2].mxu0 }
 0x18e   : > { %475 = vrot.lane.b32.xlu0 %v458_v17, %s791_s18  ;;  %v727_v20 = vpop.f32.mrb[3].mxu0 }
 0x190   : > { %483 = vrot.lane.b32.xlu1 %v456_v14, %s792_s19 }
 0x1fe   : > { %v479_v22 = vpop.permute.xlu1 %478 }
 0x200   : > { %v476_v23 = vpop.permute.xlu0 %475 }
 0x201   : > { %v481_v24 = vsel %vm467_vm2, %v476_v23, %v479_v22 }
 0x202   : > { %v487_v25 = vmul.f32 %v481_v24, %v457_v21  ;;  %v484_v26 = vpop.permute.xlu1 %483 }
 0x203   : > { %v486_v27 = vmul.f32 %v484_v26, %v450_v15 }
 0x204   : > { %489 = vrot.lane.b32.xlu1 %v487_v25, %s792_s19 }
 0x208   : > { %460 = vrot.lane.b32.xlu1 %v458_v17, %s790_s17 }
 0x20c   : > { %464 = vrot.lane.b32.xlu1 %v450_v15, %s793_s22 }
 0x276   : > { %v490_v28 = vpop.permute.xlu1 %489 }
 0x277   : > { %v492_v29 = vadd.f32 %v490_v28, %v486_v27 }
 0x279   : > { %v715_v30 = vpack.c.bf16 %v492_v29, %v492_v29 }
 0x27a   : > { %v461_v31 = vpop.permute.xlu1 %460 }
 0x27b   : > { %497 = vrot.lane.b32.xlu1 %v715_v30, %s794_s23 }
 0x27e   : > { %v465_v33 = vpop.permute.xlu1 %464 }
 0x27f   : > { %v468_v34 = vsel %vm467_vm2, %v461_v31, %v465_v33  ;;  %505 = vrot.lane.b32.xlu1 %v716_v32, %s795_s28 }
 0x280   : > { %v470_v35 = vmul.f32 %v468_v34, %v457_v21 }
 0x282   : > { %v471_v36 = vadd.f32 %v470_v35, %v469_v18 }
 0x284   : > { %v472_v37 = vpack.c.bf16 %v471_v36, %v471_v36 }
 0x286   : > { %474 = vst.msk [vmem:[%s361_s9] sm:$0xf] %vm473_vm3, %v472_v37 }
 0x2ed   : > { %v498_v38 = vpop.permute.xlu1 %497 }
 0x2ee   : > { %500 = vst.msk [vmem:[%s368_s12] sm:$0xf] %vm473_vm3, %v498_v38 }
 0x2f1   : > { %v506_v39 = vpop.permute.xlu1 %505 }
 0x2f2   : > { %508 = vst.msk [vmem:[%s375_s15] sm:$0xf] %vm473_vm3, %v506_v39 }
 0x2f3 PF: > { %s18_s26 = sadd.s32 1, %s786_s26   ;;  %s906_s24 = smov %s782_s25 }
 0x2f4   : > { %p15_p5 = scmp.ge.s32.totalorder %s18_s26, 4   ;;  %s907_s25 = smov %s909_s27 }
 0x2f6   :  { %17 = sbr.rel (!%p15_p5) target bundleno = 2 (0x2), region = 100 }

// kernel: transformer_block.4
= control target key start
LH: loop header
LB: loop body
LE: loop exit
PB: predicated region body
PF: predicated region fallthrough
CT: control target
= control target key end

     0   :  { %s790_s12 = smov 0   ;;  %s792_s13 = smov 0   ;;  %s864_s0 = inlined_call_operand.vmem [shape: bf16[2,4,8,8], index: 0, kind: input, shape index: {}]   ;;  %s865_s1 = inlined_call_operand.vmem [shape: bf16[2,4,8,8], index: 1, kind: input, shape index: {}]   ;;  %s866_s2 = inlined_call_operand.vmem [shape: bf16[2,4,8,8], index: 2, kind: input, shape index: {}]   ;;  %s867_s3 = inlined_call_operand.vmem [shape: bf16[2,4,8,8], index: 3, kind: output, shape index: {}]  }
   0x1   :  { %s794_s14 = smov 0   ;;  %s796_s15 = smov 0  }
   0x2   :  { %s798_s16 = smov 0  }
   0x3 LB: > { %s35_s17 = sadd.s32 1, %s756_s14  ;;  %s39_s18 = sadd.s32 1, %s760_s15  ;;  %s764_s16 = sphi %s798_s16, %s13_s16   ;;  %s760_s15 = sphi %s796_s15, %s871_s15   ;;  %s756_s14 = sphi %s794_s14, %s870_s14   ;;  %s752_s13 = sphi %s792_s13, %s869_s13   ;;  %s748_s12 = sphi %s790_s12, %s868_s12  }
   0x4   : > { %p37_p0 = scmp.ge.s32.totalorder %s35_s17, 4  ;;  %p645_p1 = scmp.ge.s32.totalorder %s764_s16, 1 }
   0x5   : > { %p217_p2 = scmp.lt.s32.totalorder %s764_s16, 9 }
   0x6   : > { %s873_s17 = smov (%p37_p0, %s35_s17), 0  ;;  %s875_s18 = smov (!%p37_p0, %s39_s18), %s760_s15 }
   0x7   : > { %p218_p3 = pnand %p645_p1, %p217_p2  ;;  %p41_p4 = scmp.ge.s32.totalorder %s875_s18, 2 }
   0x8   : > { %p275_p5 = scmp.lt.s32.totalorder (!%p218_p3), %s752_s13, 1  ;;  %p277_p6 = scmp.lt.s32.totalorder (!%p218_p3), %s748_s12, 3  ;;  %vm327_vm0 = vcmask (!%p218_p3), 64512   ;;  %v766_v0 = vmov (!%p218_p3), 0.0   ;;  %vm767_vm1 = vmmov (!%p218_p3), 0   ;;  %vm324_vm2 = vcmask (!%p218_p3), 7168  }
   0x9   : > { %s877_s18 = smov (%p41_p4, %s875_s18), 0  ;;  %221 = sbr.rel (%p218_p3) target bundleno = 830 (0x33e), region = 32 }
   0xa   : > { %662 = vmatprep.subr.bf16.mxu0 (!%p218_p3), %v766_v0  ;;  %328 = vst.msk [vmem:[#allocation4] sm:$0xff] (!%p218_p3), %vm327_vm0, %v766_v0  ;;  %664 = vmatprep.mubr.msk.bf16.mxu0 (!%p218_p3), %vm767_vm1, %v766_v0  ;;  %v768_v4 = vmov (!%p218_p3), -inf   ;;  %v386_v5 = vlaneseq (!%p218_p3)  ;;  %v769_v15 = vmov (!%p218_p3), 0   ;;  %vm432_vm4 = vcmask (!%p218_p3), 1043456  }
   0xb   : > { %668 = vmatprep.subr.bf16.mxu1 (!%p218_p3), %v766_v0  ;;  %670 = vmatprep.mubr.msk.bf16.mxu1 (!%p218_p3), %vm767_vm1, %v766_v0  ;;  %325 = vst.msk [vmem:[#allocation2] sm:$0xff] (!%p218_p3), %vm324_vm2, %v768_v4  ;;  %326 = vst.msk [vmem:[#allocation3] sm:$0xff] (!%p218_p3), %vm324_vm2, %v766_v0  ;;  %vm492_vm5 = vcmask (!%p218_p3), 60416  }
   0xc   : > { %v387_v6 = vshrl.u32 (!%p218_p3), %v386_v5, 7  ;;  %v391_v7 = vand.u32 (!%p218_p3), 127, %v386_v5  ;;  %718 = vset.pattern.permute.xlu0 (!%p218_p3), %v769_v15  ;;  %719 = vset.pattern.permute.xlu1 (!%p218_p3), %v769_v15 }
   0xe   : > { %vm394_vm3 = vcmp.ge.s32.totalorder (!%p218_p3), %v387_v6, %v391_v7 }
  0x10   : > { %s879_s13 = smov (!%p275_p5, %s752_s13), 1  ;;  %s881_s12 = smov (!%p277_p6, %s748_s12), 3 }
  0x11   : > { %s646_s19 = sshll.u32 %s879_s13, 2  ;;  %v420_v36 = vld [vmem:[#allocation4] sm:$0xff] }
  0x12   : > { %s283_s20 = sadd.s32 %s646_s19, %s881_s12  ;;  %v396_v16 = vld [vmem:[#allocation2] sm:$0xff]  ;;  %v412_v30 = vld [vmem:[#allocation3] sm:$0xff] }
  0x13   : > { %s821_s21 = sshll.u32 %s283_s20, 2 }
  0x14   : > { %s296_s24 = scalar_lea.vmem %s865_s1, %s821_s21  ;;  %s285_s27 = scalar_lea.vmem %s864_s0, %s821_s21 }
  0x15   : > { %v337_v1 = vld [vmem:[%s296_s24] sm:$0xf]  ;;  %s307_s30 = scalar_lea.vmem %s866_s2, %s821_s21  ;;  %s318_s6 = scalar_lea.vmem %s867_s3, %s821_s21 }
  0x16   : > { %v343_v2 = vsel %vm327_vm0, %v337_v1, 0  ;;  %v336_v3 = vld [vmem:[%s285_s27] sm:$0xf] }
  0x17   : > { %663 = vmatpush3.bf16.xpose.msra.mxu0 %v343_v2  ;;  %v428_v20 = vld [vmem:[%s307_s30] sm:$0xf] }
  0x18   : > { %v434_v21 = vsel %vm432_vm4, %v428_v20, 0 }
  0x19   : > { %669 = vmatpush3.bf16.msra.mxu1 %v434_v21 }
  0x1e   : > { %665 = vmatmul.mubr.msk.bf16.vlgmr.msra.gmra.mrb[0].mxu0 %vm327_vm0, %v336_v3 }
  0xf1   : > { %v379_v8 = vpop.f32.mrb[0].mxu0 }
  0xf2   : > { %v385_v9 = vmul.f32 0.35355338, %v379_v8  ;;  %v666_v10 = vpop.f32.mrb[1].mxu0 }
  0xf3   : > { %v382_v11 = vpop.f32.mrb[2].mxu0 }
  0xf4   : > { %v667_v12 = vpop.f32.mrb[3].mxu0  ;;  %v395_v13 = vsel %vm394_vm3, %v385_v9, -1e+09 }
  0xf5   : > { %v397_v14 = vsel %vm327_vm0, %v395_v13, -inf }
  0xf6   : > { %398 = vmax.xlane.f32.xlu0 %v397_v14 }
 0x183   : > { %v399_v17 = vpop.xlane.xlu0 %398 }
 0x184   : > { %v400_v18 = vmax.f32 %v396_v16, %v399_v17 }
 0x186   : > { %v401_v19 = vsub.f32 %v396_v16, %v400_v18  ;;  %478 = vst.msk [vmem:[#allocation2] sm:$0xff] %vm324_vm2, %v400_v18  ;;  %406 = vperm.xlu0 %718, %v400_v18  }
 0x188   : > { %v402_v28 = vmul.f32 1.442695, %v401_v19 }
 0x205   : > { %v407_v22 = vpop.permute.xlu0 %406 }
 0x206   : > { %v409_v23 = vsub.f32 %v395_v13, %v407_v22 }
 0x208   : > { %v410_v24 = vmul.f32 1.442695, %v409_v23 }
 0x20a   : > { %720 = vpow2.f32 %v410_v24 }
 0x20b   : > { %722 = vpow2.f32 %v402_v28 }
 0x214   : > { %v721_v25 = vpop.eup %720 }
 0x215   : > { %v414_v26 = vsel %vm327_vm0, %v721_v25, 0.0  ;;  %v427_v27 = vpack.c.bf16 %v721_v25, %v721_v25  ;;  %v723_v29 = vpop.eup %722 }
 0x216   : > { %415 = vadd.xlane.f32.xlu1 %v414_v26  ;;  %v413_v31 = vmul.f32 %v723_v29, %v412_v30 }
 0x217   : > { %671 = vmatmul.mubr.msk.bf16.vlgmr.msra.gmra.mrb[0].mxu1 %vm327_vm0, %v427_v27 }
 0x227   : > { %423 = vperm.xlu1 %719, %v723_v29  }
 0x2a3   : > { %v416_v32 = vpop.xlane.xlu1 %415 }
 0x2a4   : > { %v417_v33 = vadd.f32 %v416_v32, %v413_v31 }
 0x2a6   : > { %419 = vst.msk [vmem:[#allocation3] sm:$0xff] %vm324_vm2, %v417_v33 }
 0x2a7   : > { %v424_v37 = vpop.permute.xlu1 %423 }
 0x2a8   : > { %v426_v38 = vmul.f32 %v424_v37, %v420_v36 }
 0x2ad   : > { %v482_v34 = vld [vmem:[#allocation3] sm:$0xff] }
 0x2ae   : > { %724 = vrcp.f32 %v482_v34 }
 0x2b8   : > { %v725_v35 = vpop.eup %724 }
 0x2b9   : > { %487 = vperm.xlu1 %719, %v725_v35  }
 0x2ea   : > { %v470_v39 = vpop.f32.mrb[0].mxu1 }
 0x2eb   : > { %v476_v40 = vadd.f32 %v470_v39, %v426_v38  ;;  %v672_v41 = vpop.f32.mrb[1].mxu1 }
 0x2ec   : > { %v473_v42 = vpop.f32.mrb[2].mxu1 }
 0x2ed   : > { %477 = vst.msk [vmem:[#allocation4] sm:$0xff] %vm327_vm0, %v476_v40  ;;  %v673_v43 = vpop.f32.mrb[3].mxu1 }
 0x2f4   : > { %v484_v44 = vld [vmem:[#allocation4] sm:$0xff] }
 0x338   : > { %v488_v45 = vpop.permute.xlu1 %487 }
 0x339   : > { %v490_v46 = vmul.f32 %v488_v45, %v484_v44 }
 0x33b   : > { %v491_v47 = vpack.c.bf16 %v490_v46, %v490_v46 }
 0x33d   : > { %493 = vst.msk [vmem:[%s318_s6] sm:$0xf] %vm492_vm5, %v491_v47 }
 0x33e PF: > { %s13_s16 = sadd.s32 1, %s764_s16   ;;  %s868_s12 = smov %s756_s14 }
 0x33f   : > { %p10_p7 = scmp.ge.s32.totalorder %s13_s16, 10   ;;  %s869_s13 = smov %s760_s15 }
 0x340   : > { %s870_s14 = smov %s873_s17  ;;  %s871_s15 = smov %s877_s18 }
 0x341   :  { %12 = sbr.rel (!%p10_p7) target bundleno = 3 (0x3), region = 80 }

// kernel: transformer_block.5
= control target key start
LH: loop header
LB: loop body
LE: loop exit
PB: predicated region body
PF: predicated region fallthrough
CT: control target
= control target key end

     0   :  { %11 = vsyncpa [#allocation6], 0  ;;  %s1217_s0 = inlined_call_operand.vmem [shape: bf16[2,8,32], index: 0, kind: input, shape index: {}]   ;;  %s1218_s1 = inlined_call_operand.vmem [shape: f32[2,8,32], index: 1, kind: input, shape index: {}]   ;;  %s1219_s2 = inlined_call_operand.vmem [shape: bf16[32,32], index: 2, kind: input, shape index: {}]   ;;  %s1220_s3 = inlined_call_operand.vmem [shape: f32[1,32], index: 3, kind: input, shape index: {}]   ;;  %s1221_s4 = inlined_call_operand.vmem [shape: bf16[1,32,256], index: 4, kind: input, shape index: {}]   ;;  %s1222_s5 = inlined_call_operand.vmem [shape: bf16[128,32], index: 5, kind: input, shape index: {}]   ;;  %s1223_s6 = inlined_call_operand.hbm [shape: f32[2,8,32], index: 6, kind: output, shape index: {}]  }
   0x1   :  { %13 = vsyncpa [#allocation6 + $0x1], 0  ;;  %s1037_s21 = smov 0   ;;  %s1039_s22 = smov 0  }
   0x2   :  { %s1041_s23 = smov 0   ;;  %s1043_s24 = smov 0  }
   0x3   :  { %s1045_s25 = smov 0   ;;  %s1047_s26 = smov 0  }
   0x4 LB: > { %s766_s27 = sadd.s32 4294967295, %s996_s26   ;;  %s767_s28 = sadd.s32 4294967294, %s996_s26   ;;  %s996_s26 = sphi %s1047_s26, %s19_s26   ;;  %s992_s25 = sphi %s1045_s25, %s1230_s25   ;;  %s988_s24 = sphi %s1043_s24, %s1229_s24   ;;  %s984_s23 = sphi %s1041_s23, %s1228_s23   ;;  %s980_s22 = sphi %s1039_s22, %s1227_s22   ;;  %s976_s21 = sphi %s1037_s21, %s1226_s21  }
   0x5   : > { %s38_s29 = sadd.s32 1, %s992_s25  ;;  %s197_s30 = sadd.s32 1, %s984_s23 }
   0x6   : > { %p40_p0 = scmp.ge.s32.totalorder %s38_s29, 2  ;;  %p207_p1 = scmp.ne.s32.totalorder %s984_s23, %s980_s22 }
   0x7   : > { %p208_p2 = scmp.eq.s32.totalorder %s766_s27, 1  ;;  %p213_p3 = scmp.ne.s32.totalorder %s980_s22, %s976_s21 }
   0x8   : > { %s1232_s29 = smov (%p40_p0, %s38_s29), 0  ;;  %p214_p5 = scmp.eq.s32.totalorder %s767_s28, 1 }
   0x9   : > { %p1077_p4 = por %p208_p2, %p207_p1  ;;  %s192_s8 = ssub.s32 %s992_s25, %s1232_s29 }
   0xa   : > { %p772_p6 = scmp.ge.s32.totalorder %s996_s26, 1  ;;  %p195_p7 = scmp.eq.s32.totalorder %s192_s8, 0 }
   0xb   : > { %p1084_p8 = por %p214_p5, %p213_p3  ;;  %p275_p9 = scmp.lt.s32.totalorder %s996_s26, 3 }
   0xc   : > { %s1090_s10 = scalar_select %p195_p7, %s984_s23, %s197_s30  }
   0xd   : > { %p276_p10 = pnand %p772_p6, %p275_p9 }
   0xe   : > { %v896_v0 = vld [vmem:[%s1219_s2] sm:$0xff] (!%p276_p10)   ;;  %v998_v1 = vmov (!%p276_p10), 0.0   ;;  %v897_v2 = vld [vmem:[%s1219_s2 + $0x8] sm:$0xff] (!%p276_p10)   ;;  %vm999_vm0 = vmmov (!%p276_p10), 0   ;;  %p324_p11 = scmp.lt.s32.totalorder (!%p276_p10), %s988_s24, 1  ;;  %vm371_vm1 = vcmask (!%p276_p10), 261120  }
   0xf   : > { %279 = sbr.rel (%p276_p10) target bundleno = 897 (0x381), region = 44  ;;  %810 = vmatprep.subr.bf16.mxu1 (!%p276_p10), %v998_v1  ;;  %818 = vmatprep.subr.bf16.mxu0 (!%p276_p10), %v998_v1  ;;  %438 = vst.msk [vmem:[#allocation4] sm:$0xff] (!%p276_p10), %vm371_vm1, %v998_v1  ;;  %v900_v12 = vld [vmem:[%s1221_s4 + $0x4] ss:$8 sps:$4 sm:$0xff] (!%p276_p10)   ;;  %v898_v13 = vld [vmem:[%s1221_s4] ss:$8 sps:$4 sm:$0xff] (!%p276_p10)  }
  0x10   : > { %811 = vmatpush3.bf16.msra.mxu1 (!%p276_p10), %v896_v0  ;;  %814 = vmatprep.mubr.msk.bf16.mxu1 (!%p276_p10), %vm999_vm0, %v998_v1  ;;  %v903_v14 = vld [vmem:[%s1221_s4 + $0x14] ss:$8 sps:$4 sm:$0xff] (!%p276_p10)   ;;  %v901_v15 = vld [vmem:[%s1221_s4 + $0x10] ss:$8 sps:$4 sm:$0xff] (!%p276_p10)   ;;  %v1000_v16 = vmov (!%p276_p10), 0   ;;  %vm436_vm2 = vcmask (!%p276_p10), 257024  }
  0x11   : > { %812 = vmatprep.subr.bf16.mxu1 (!%p276_p10), %v998_v1  ;;  %834 = vmatprep.mubr.msk.bf16.mxu0 (!%p276_p10), %vm999_vm0, %v998_v1  ;;  %v779_v21 = vld [vmem:[%s1220_s3] ss:$0 sm:$0xff] (!%p276_p10)  ;;  %v905_v27 = vld [vmem:[%s1222_s5 + $0x8] sm:$0xff] (!%p276_p10)   ;;  %v906_v28 = vld [vmem:[%s1222_s5 + $0x10] sm:$0xff] (!%p276_p10)   ;;  %s321_s28 = sand.u32 (!%p276_p10), 1, %s980_s22   ;;  %s795_s8 = sshll.u32 (!%p276_p10), %s988_s24, 7 }
  0x12   : > { %v904_v26 = vld [vmem:[%s1222_s5] sm:$0xff] (!%p276_p10)   ;;  %v907_v29 = vld [vmem:[%s1222_s5 + $0x18] sm:$0xff] (!%p276_p10)   ;;  %v909_v31 = vld [vmem:[%s1222_s5 + $0x28] sm:$0xff] (!%p276_p10)  }
  0x13   : > { %819 = vmatpush3.bf16.msra.mxu0 (!%p276_p10), %v904_v26  ;;  %v908_v30 = vld [vmem:[%s1222_s5 + $0x20] sm:$0xff] (!%p276_p10)   ;;  %v910_v32 = vld [vmem:[%s1222_s5 + $0x30] sm:$0xff] (!%p276_p10)   ;;  %v911_v33 = vld [vmem:[%s1222_s5 + $0x38] sm:$0xff] (!%p276_p10)  }
  0x14   : > { %813 = vmatpush3.bf16.msra.mxu1 (!%p276_p10), %v897_v2  ;;  %820 = vmatprep.subr.bf16.mxu0 (!%p276_p10), %v998_v1 }
  0x15   : > { %468 = vmatprep.subr.bf16.mxu1 (!%p276_p10), %v900_v12 }
  0x16   : > { %s325_s15 = scalar_select %p324_p11, %s988_s24, 1  ;;  %v518_v45 = vld [vmem:[#allocation4] sm:$0xff] }
  0x17   : > { %821 = vmatpush3.bf16.msra.mxu0 %v905_v27  ;;  %s1001_s24 = smov [#allocation5]  }
  0x18   : > { %s774_s16 = sshll.u32 %s325_s15, 2  ;;  %s775_s20 = sshll.u32 %s325_s15, 3  ;;  %822 = vmatprep.subr.bf16.mxu0 %v998_v1 }
  0x19   : > { %s330_s19 = scalar_lea.vmem %s1217_s0, %s774_s16  ;;  %s337_s30 = scalar_lea.vmem %s1218_s1, %s775_s20 }
  0x1a   : > { %v354_v3 = vld [vmem:[%s330_s19] sm:$0xf]  ;;  %s1169_s15 = scalar_lea.hbm %s1223_s6, %s795_s8  ;;  %s633_s16 = scalar_lea.sflag [#allocation6], %s321_s28 }
  0x1b   : > { %815 = vmatmul.mubr.msk.bf16.vlgmr.msra.gmra.mrb[0].mxu1 %vm371_vm1, %v354_v3  ;;  %v415_v4 = vld [vmem:[%s337_s30] sm:$0xff]  ;;  %823 = vmatpush3.bf16.msra.mxu0 %v906_v28  ;;  %s773_s30 = sshll.u32 %s321_s28, 3  ;;  %s922_s18 = sshll.u32 %s1001_s24, 4  ;;  %s923_s18 = int_to_ptr.vmem [resolvable:$false] %s922_s18 }
  0x1c   : > { %469 = vmatpush1.bf16.msra.mxu1 %v898_v13  ;;  %500 = vmatprep.mubr.bf16.mxu1 %v1000_v16  ;;  %s323_s11 = scalar_lea.vmem [#allocation5], %s773_s30  ;;  %s924_s19 = scalar_lea.vmem %s923_s18, 256 }
  0x1d   : > { %470 = vmatprep.subr.bf16.mxu1 %v903_v14  ;;  %824 = vmatprep.subr.bf16.mxu0 %v998_v1  ;;  %s647_s12 = sshll.u32 %s323_s11, 4  ;;  %s1171_s12 = int_to_ptr.vmem [resolvable:$true] %s647_s12 }
  0x1e   : > { %s918_s17 = scalar_lea.vmem %s1171_s12, 128  ;;  %p925_p1 = scmp.lt.s32.totalorder %s1171_s12, %s923_s18 }
  0x1f   : > { %825 = vmatpush3.bf16.msra.mxu0 %v907_v29  ;;  %p919_p12 = scmp.ne.s32.totalorder %s1171_s12, %s918_s17  ;;  %p926_p2 = scmp.lt.s32.totalorder %s924_s19, %s918_s17 }
  0x20   : > { %471 = vmatpush1.bf16.msra.mxu1 %v901_v15  ;;  %826 = vmatprep.subr.bf16.mxu0 %v998_v1 }
  0x21   : > { %p920_p13 = pnand %p919_p12, %p1077_p4  ;;  %p927_p3 = por %p926_p2, %p925_p1 }
  0x23   : > { %827 = vmatpush3.bf16.msra.mxu0 %v908_v30  ;;  %p921_p0 = pneg %p920_p13 }
  0x24   : > { %828 = vmatprep.subr.bf16.mxu0 %v998_v1 }
  0x25   : > { %p928_p5 = pnand %p927_p3, %p921_p0 }
  0x27   : > { %829 = vmatpush3.bf16.msra.mxu0 %v909_v31 }
  0x28   : > { %830 = vmatprep.subr.bf16.mxu0 %v998_v1 }
  0x2b   : > { %831 = vmatpush3.bf16.msra.mxu0 %v910_v32 }
  0x2c   : > { %832 = vmatprep.subr.bf16.mxu0 %v998_v1 }
  0x2f   : > { %833 = vmatpush3.bf16.msra.mxu0 %v911_v33 }
  0xee   : > { %v409_v5 = vpop.f32.mrb[0].mxu1 }
  0xef   : > { %v416_v6 = vadd.f32 %v415_v4, %v409_v5  ;;  %v816_v7 = vpop.f32.mrb[1].mxu1 }
  0xf0   : > { %v412_v8 = vpop.f32.mrb[2].mxu1 }
  0xf1   : > { %417 = vst.msk [vmem:[#allocation2] sm:$0xff] %vm371_vm1, %v416_v6  ;;  %v817_v9 = vpop.f32.mrb[3].mxu1  ;;  %v418_v10 = vmul.f32 %v416_v6, %v416_v6 }
  0xf3   : > { %v419_v11 = vsel %vm371_vm1, %v418_v10, 0.0 }
  0xf4   : > { %420 = vadd.xlane.f32.xlu0 %v419_v11 }
  0xf8   : > { %v628_v51 = vld [vmem:[#allocation2] sm:$0xff] }
 0x181   : > { %v421_v17 = vpop.xlane.xlu0 %420 }
 0x182   : > { %v423_v18 = vmul.f32 0.03125, %v421_v17 }
 0x184   : > { %v424_v19 = vadd.f32 1e-06, %v423_v18 }
 0x186   : > { %912 = vrsqrt.f32 %v424_v19 }
 0x190   : > { %v913_v20 = vpop.eup %912 }
 0x191   : > { %v426_v22 = vmul.f32 %v913_v20, %v416_v6 }
 0x193   : > { %v434_v23 = vmul.f32 %v779_v21, %v426_v22 }
 0x195   : > { %v435_v24 = vpack.c.bf16 %v434_v23, %v434_v23 }
 0x197   : > { %437 = vst.msk [vmem:[#allocation3] sm:$0xf] %vm436_vm2, %v435_v24 }
 0x19e   : > { %v439_v25 = vld [vmem:[#allocation3] sm:$0xf] }
 0x19f   : > { %784 = vmatmul.mubr.msk.bf16.vlgmr.msra.gmra.mrb[4].mxu1 %vm371_vm1, %v439_v25 }
 0x272   : > { %v502_v34 = vpop.f32.mrb[4].mxu1 }
 0x273   : > { %v785_v35 = vmul.f32 -1.442695, %v502_v34  ;;  %v504_v36 = vpop.f32.mrb[5].mxu1 }
 0x274   : > { %v506_v37 = vpop.f32.mrb[6].mxu1 }
 0x275   : > { %914 = vpow2.f32 %v785_v35  ;;  %v507_v38 = vpop.f32.mrb[7].mxu1 }
 0x27f   : > { %v915_v39 = vpop.eup %914 }
 0x280   : > { %v512_v40 = vadd.f32 1.0, %v915_v39 }
 0x282   : > { %916 = vrcp.f32 %v512_v40 }
 0x28c   : > { %v917_v41 = vpop.eup %916 }
 0x28d   : > { %v515_v42 = vmul.f32 %v917_v41, %v502_v34 }
 0x28f   : > { %v516_v43 = vmul.f32 %v515_v42, %v504_v36 }
 0x291   : > { %v517_v44 = vpack.c.bf16 %v516_v43, %v516_v43 }
 0x293   : > { %835 = vmatmul.mubr.bf16.vlgmr.msra.gmra.mrb[0].mxu0 %v517_v44 }
 0x366   : > { %v617_v46 = vpop.f32.mrb[0].mxu0 }
 0x367   : > { %v623_v47 = vadd.f32 %v617_v46, %v518_v45  ;;  %v836_v48 = vpop.f32.mrb[1].mxu0 }
 0x368   : > { %v620_v49 = vpop.f32.mrb[2].mxu0 }
 0x369   : > { %624 = vst.msk [vmem:[#allocation4] sm:$0xff] %vm371_vm1, %v623_v47  ;;  %v837_v50 = vpop.f32.mrb[3].mxu0 }
 0x370   : > { %v629_v52 = vld [vmem:[#allocation4] sm:$0xff] }
 0x371   : > { %v630_v53 = vadd.f32 %v629_v52, %v628_v51 }
 0x373   : > { %631 = vst.msk [vmem:[%s323_s11] sm:$0xff] %vm371_vm1, %v630_v53 }
 0x374   : > { %931 = shalt.err (!%p928_p5)
}
 0x375   : > { %s932_s20 = scalar_lea.hbm %s1169_s15, 128  ;;  %s936_s30 = scalar_lea.hbm %s1223_s6, 256 }
 0x376   : > { %p933_p6 = scmp.ne.s32.totalorder %s1169_s15, %s932_s20  ;;  %p937_p10 = scmp.lt.u32.totalorder %s1169_s15, %s1223_s6 }
 0x377   : > { %p938_p11 = scmp.lt.u32.totalorder %s936_s30, %s932_s20  ;;  %p940_p13 = scmp.lt.u32.totalorder %s932_s20, %s1169_s15 }
 0x378   : > { %p934_p7 = pnand %p933_p6, %p1077_p4 }
 0x379   : > { %p939_p12 = por %p938_p11, %p937_p10 }
 0x37a   : > { %p935_p9 = pneg %p934_p7 }
 0x37b   : > { %p941_p0 = por %p940_p13, %p939_p12 }
 0x37d   : > { %p942_p1 = pnand %p941_p0, %p935_p9 }
 0x37f   : > { %945 = shalt.err (!%p942_p1)
}
 0x380   : > { %838 = dma.vmem_to_hbm [thread:$0]  (%p1077_p4), %s1171_s12, 128, %s1169_s15, %s633_s16  }
 0x381 PF: > { %p844_p2 = scmp.ge.s32.totalorder %s996_s26, 2  ;;  %s659_s13 = sand.u32 1, %s976_s21  }
 0x382   : > { %s660_s14 = scalar_lea.sflag [#allocation6], %s659_s13 }
 0x383   : > { %p841_p3 = pnand %p844_p2, %p1084_p8 }
 0x385   : > { %971 = dma.done.wait (!%p841_p3), %s660_s14, 128  }
 0x386   : > { %973 = vsyncadd (!%p841_p3), %s660_s14, 4294967168  ;;  %s19_s26 = sadd.s32 1, %s996_s26   ;;  %s1226_s21 = smov %s980_s22 }
 0x387   : > { %p16_p5 = scmp.ge.s32.totalorder %s19_s26, 4   ;;  %s1227_s22 = smov %s984_s23 }
 0x388   : > { %s1228_s23 = smov %s1090_s10  ;;  %s1229_s24 = smov %s992_s25 }
 0x389   : > { %s1230_s25 = smov %s1232_s29  ;;  %18 = sbr.rel (!%p16_p5) target bundleno = 4 (0x4), region = 96 }
 0x390   :  { %665 = vsyncpa [#allocation6], 1 }
 0x391   :  { %667 = vsyncpa [#allocation6 + $0x1], 1 }

</bundles_post_ra>
